<compile_context>
chip_gen: v5e
topology: v5e:2x2
jax: 0.10.0
libtpu: 0.0.40
codegen_flags: <defaults>
</compile_context>

<pallas_src>
import functools

import jax
import jax.numpy as jnp
from jax import lax
from jax.experimental import pallas as pl
from jax.experimental.pallas import tpu as pltpu

EPS = 1e-8


# --------------------------------------------------------------------------
# Generation-aware VMEM budgeting.
# --------------------------------------------------------------------------
def _vmem_capacity_bytes():
    try:
        info = pltpu.get_tpu_info()
        for attr in ("vmem_capacity_bytes", "vmem_bytes", "vmem_size_bytes"):
            v = getattr(info, attr, None)
            if v:
                return int(v)
    except Exception:
        pass
    return 64 * 1024 * 1024  # conservative fallback (v7x per-core VMEM)


def _usable_vmem_bytes():
    cap = _vmem_capacity_bytes()
    # Leave headroom for Pallas/Mosaic internals; ~108 MiB on v5e/v6e, ~54 MiB
    # on v7x.
    return int(min(cap - (8 << 20), cap * 0.85))


# --------------------------------------------------------------------------
# Path A: whole-(N, K) resident blocks, auto-pipelined.
# --------------------------------------------------------------------------
def _gln_resident_kernel(y_ref, gamma_ref, beta_ref, o_ref):
    y = y_ref[...].astype(jnp.float32)                     # (1, N, K)
    inv_n = 1.0 / float(y.shape[1] * y.shape[2])

    s = jnp.sum(y)
    s2 = jnp.sum(y * y)
    mean = s * inv_n
    var = jnp.maximum(s2 * inv_n - mean * mean, 0.0)       # guard cancellation
    inv_std = lax.rsqrt(var + EPS)                         # EUP slot

    g = gamma_ref[...].astype(jnp.float32)                 # (N, 1)
    b = beta_ref[...].astype(jnp.float32)                  # (N, 1)
    scale = (g * inv_std)[None, :, :]                      # (1, N, 1)
    shift = b[None, :, :] - mean * scale                   # (1, N, 1)

    o_ref[...] = (y * scale + shift).astype(o_ref.dtype)   # fused FMA


def _gln_resident(y, gamma, beta, vmem_limit):
    M, N, K = y.shape
    itemsize = y.dtype.itemsize
    cost = pl.CostEstimate(
        flops=6 * M * N * K,
        transcendentals=M,
        bytes_accessed=2 * M * N * K * itemsize + 2 * N * 4,
    )
    # NOTE: grid=(M,) "parallel" leaves one v7x TensorCore idle when M == 1;
    # acceptable for this memory-bound op (both cores share HBM bandwidth).
    return pl.pallas_call(
        _gln_resident_kernel,
        out_shape=jax.ShapeDtypeStruct((M, N, K), y.dtype),
        grid_spec=pltpu.PrefetchScalarGridSpec(
            num_scalar_prefetch=0,
            grid=(M,),
            in_specs=[
                pl.BlockSpec((1, N, K), lambda m: (m, 0, 0)),
                pl.BlockSpec((N, 1), lambda m: (0, 0)),
                pl.BlockSpec((N, 1), lambda m: (0, 0)),
            ],
            out_specs=pl.BlockSpec((1, N, K), lambda m: (m, 0, 0)),
        ),
        compiler_params=pltpu.CompilerParams(
            dimension_semantics=("parallel",),
            vmem_limit_bytes=int(vmem_limit),
        ),
        cost_estimate=cost,
    )(y, gamma, beta)


# --------------------------------------------------------------------------
# Path B: scratch-resident single-read path (manual DMA double-buffering).
# --------------------------------------------------------------------------
def _gln_scratch_kernel(y_hbm, gamma_ref, beta_ref, o_hbm,
                        yv, obuf, s_ref, s2_ref, scale_ref, shift_ref,
                        in_sems, out_sems, *, tn, nt, n_total):
    m = pl.program_id(0)
    aligned = (tn % 8 == 0)

    def row0(i):
        r0 = i * tn
        return pl.multiple_of(r0, 8) if aligned else r0

    def in_copy(i):
        r0 = row0(i)
        return pltpu.make_async_copy(
            y_hbm.at[m, pl.ds(r0, tn), :],
            yv.at[pl.ds(r0, tn), :],
            in_sems.at[i % 2])

    def out_copy(i, slot):
        r0 = row0(i)
        return pltpu.make_async_copy(
            obuf.at[slot],
            o_hbm.at[m, pl.ds(r0, tn), :],
            out_sems.at[slot])

    # ---- phase 1: stream row tiles into the resident slab, accumulate stats.
    in_copy(0).start()
    s_ref[...] = jnp.zeros_like(s_ref)
    s2_ref[...] = jnp.zeros_like(s2_ref)

    @pl.loop(0, nt)
    def _stats(i):
        in_copy(i).wait()

        @pl.when(i + 1 < nt)
        def _():
            in_copy(i + 1).start()

        tile = yv[pl.ds(row0(i), tn), :].astype(jnp.float32)
        s_ref[...] = s_ref[...] + jnp.sum(tile)
        s2_ref[...] = s2_ref[...] + jnp.sum(tile * tile)

    # ---- per-batch scale / shift (y*scale + shift == gamma*(y-mean)/std + b).
    inv_n = 1.0 / n_total
    mean = s_ref[...] * inv_n                              # (1, 1)
    var = jnp.maximum(s2_ref[...] * inv_n - mean * mean, 0.0)
    istd = lax.rsqrt(var + EPS)
    g = gamma_ref[...].astype(jnp.float32)                 # (N, 1)
    b = beta_ref[...].astype(jnp.float32)                  # (N, 1)
    scale_ref[...] = g * istd
    shift_ref[...] = b - mean * (g * istd)

    # ---- phase 2: normalize out of the slab (no HBM re-read) and DMA back.
    @pl.loop(0, nt)
    def _norm(i):
        slot = i % 2

        @pl.when(i >= 2)
        def _():
            out_copy(i - 2, slot).wait()

        r0 = row0(i)
        tile = yv[pl.ds(r0, tn), :].astype(jnp.float32)
        obuf[slot] = (tile * scale_ref[pl.ds(r0, tn), :]
                      + shift_ref[pl.ds(r0, tn), :]).astype(obuf.dtype)
        out_copy(i, slot).start()

    for j in range(max(nt - 2, 0), nt):                    # static drain
        out_copy(j, j % 2).wait()


def _choose_tile_n(N, K, itemsize, target_bytes=2 << 20):
    divs = [d for d in range(1, N + 1) if N % d == 0]
    pref = [d for d in divs if d % 8 == 0] or divs
    fitting = [d for d in pref if d * K * itemsize <= target_bytes]
    return max(fitting) if fitting else min(pref)


def _gln_scratch(y, gamma, beta, vmem_limit, tile_n=None):
    M, N, K = y.shape
    itemsize = y.dtype.itemsize
    if tile_n is None:
        tile_n = _choose_tile_n(N, K, itemsize)
    assert N % tile_n == 0, "tile_n must divide N"
    nt = N // tile_n

    cost = pl.CostEstimate(
        flops=6 * M * N * K,
        transcendentals=M,
        bytes_accessed=2 * M * N * K * itemsize + 2 * N * 4,
    )
    kernel = functools.partial(
        _gln_scratch_kernel, tn=tile_n, nt=nt, n_total=float(N * K))
    return pl.pallas_call(
        kernel,
        out_shape=jax.ShapeDtypeStruct((M, N, K), y.dtype),
        grid_spec=pltpu.PrefetchScalarGridSpec(
            num_scalar_prefetch=0,
            grid=(M,),
            in_specs=[
                pl.BlockSpec(memory_space=pl.ANY),          # y stays in HBM
                pl.BlockSpec((N, 1), lambda m: (0, 0)),
                pl.BlockSpec((N, 1), lambda m: (0, 0)),
            ],
            out_specs=pl.BlockSpec(memory_space=pl.ANY),    # manual writeback
            scratch_shapes=[
                pltpu.VMEM((N, K), y.dtype),                # resident slab
                pltpu.VMEM((2, tile_n, K), y.dtype),        # out double-buffer
                pltpu.VMEM((1, 1), jnp.float32),            # sum
                pltpu.VMEM((1, 1), jnp.float32),            # sum of squares
                pltpu.VMEM((N, 1), jnp.float32),            # scale
                pltpu.VMEM((N, 1), jnp.float32),            # shift
                pltpu.SemaphoreType.DMA((2,)),              # in sems
                pltpu.SemaphoreType.DMA((2,)),              # out sems
            ],
        ),
        compiler_params=pltpu.CompilerParams(
            dimension_semantics=("arbitrary",),
            vmem_limit_bytes=int(vmem_limit),
        ),
        cost_estimate=cost,
    )(y, gamma, beta)


# --------------------------------------------------------------------------
# Path C: K-tiled two-pass fallback for slabs that do not fit VMEM at all.
# --------------------------------------------------------------------------
def _gln_stats_kernel(y_ref, gamma_ref, beta_ref, scale_ref, shift_ref,
                      s_acc, s2_acc, *, k_total, tile_k, n_total):
    k = pl.program_id(1)

    @pl.when(k == 0)
    def _():
        s_acc[...] = jnp.zeros_like(s_acc)
        s2_acc[...] = jnp.zeros_like(s2_acc)

    y = y_ref[...].astype(jnp.float32)                     # (1, N, TK)
    if k_total % tile_k != 0:
        # Masked (ragged) last tile: zero the lanes past the true length K.
        col = lax.broadcasted_iota(jnp.int32, y.shape, 2) + k * tile_k
        y = jnp.where(col < k_total, y, 0.0)
    s_acc[...] = s_acc[...] + jnp.sum(y)
    s2_acc[...] = s2_acc[...] + jnp.sum(y * y)

    @pl.when(k == pl.num_programs(1) - 1)
    def _():
        inv_n = 1.0 / n_total
        mean = s_acc[...] * inv_n                          # (1, 1)
        var = jnp.maximum(s2_acc[...] * inv_n - mean * mean, 0.0)
        istd = lax.rsqrt(var + EPS)
        g = gamma_ref[...].astype(jnp.float32)             # (N, 1)
        b = beta_ref[...].astype(jnp.float32)              # (N, 1)
        scale = g * istd                                   # (N, 1)
        shift = b - mean * scale                           # (N, 1)
        scale_ref[...] = scale[None, :, :]                 # (1, N, 1)
        shift_ref[...] = shift[None, :, :]


def _gln_apply_kernel(y_ref, scale_ref, shift_ref, o_ref):
    # Single broadcast FMA per element; scale/shift were hoisted into pass 1.
    y = y_ref[...].astype(jnp.float32)                     # (1, N, TK)
    o_ref[...] = (y * scale_ref[...] + shift_ref[...]).astype(o_ref.dtype)


def _choose_tile_k(N, K, itemsize, budget_bytes):
    # Per K-column footprint across a tile: double-buffered in + out blocks
    # plus f32 temporaries in the kernel body.
    per_col = max(N * (4 * itemsize + 12), 1)
    tk = max(128, (budget_bytes // per_col) // 128 * 128)  # lane-dense
    return int(K) if tk >= K else int(tk)


def _gln_tiled(y, gamma, beta, vmem_limit, tile_k=None):
    M, N, K = y.shape
    itemsize = y.dtype.itemsize
    if tile_k is None:
        tile_k = _choose_tile_k(N, K, itemsize, max(vmem_limit - (8 << 20), 8 << 20))
    tile_k = int(min(tile_k, K))
    nk = (K + tile_k - 1) // tile_k

    # Pass 1: per-batch fused scale/shift.
    stats_cost = pl.CostEstimate(
        flops=3 * M * N * K,
        transcendentals=M,
        bytes_accessed=M * N * K * itemsize + 2 * N * 4 + 8 * M * N,
    )
    scale, shift = pl.pallas_call(
        functools.partial(_gln_stats_kernel, k_total=K, tile_k=tile_k,
                          n_total=float(N * K)),
        out_shape=(
            jax.ShapeDtypeStruct((M, N, 1), jnp.float32),
            jax.ShapeDtypeStruct((M, N, 1), jnp.float32),
        ),
        grid_spec=pltpu.PrefetchScalarGridSpec(
            num_scalar_prefetch=0,
            grid=(M, nk),
            in_specs=[
                pl.BlockSpec((1, N, tile_k), lambda m, k: (m, 0, k)),
                pl.BlockSpec((N, 1), lambda m, k: (0, 0)),
                pl.BlockSpec((N, 1), lambda m, k: (0, 0)),
            ],
            out_specs=(
                pl.BlockSpec((1, N, 1), lambda m, k: (m, 0, 0)),
                pl.BlockSpec((1, N, 1), lambda m, k: (m, 0, 0)),
            ),
            scratch_shapes=[
                pltpu.VMEM((1, 1), jnp.float32),
                pltpu.VMEM((1, 1), jnp.float32),
            ],
        ),
        compiler_params=pltpu.CompilerParams(
            dimension_semantics=("parallel", "arbitrary"),
            vmem_limit_bytes=int(vmem_limit),
        ),
        cost_estimate=stats_cost,
    )(y, gamma, beta)

    # Pass 2: fused y * scale + shift per lane-dense tile.
    apply_cost = pl.CostEstimate(
        flops=2 * M * N * K,
        transcendentals=0,
        bytes_accessed=2 * M * N * K * itemsize + 8 * M * N,
    )
    return pl.pallas_call(
        _gln_apply_kernel,
        out_shape=jax.ShapeDtypeStruct((M, N, K), y.dtype),
        grid_spec=pltpu.PrefetchScalarGridSpec(
            num_scalar_prefetch=0,
            grid=(M, nk),
            in_specs=[
                pl.BlockSpec((1, N, tile_k), lambda m, k: (m, 0, k)),
                pl.BlockSpec((1, N, 1), lambda m, k: (m, 0, 0)),
                pl.BlockSpec((1, N, 1), lambda m, k: (m, 0, 0)),
            ],
            out_specs=pl.BlockSpec((1, N, tile_k), lambda m, k: (m, 0, k)),
        ),
        compiler_params=pltpu.CompilerParams(
            dimension_semantics=("parallel", "parallel"),
            vmem_limit_bytes=int(vmem_limit),
        ),
        cost_estimate=apply_cost,
    )(y, scale, shift)


# --------------------------------------------------------------------------
# Public wrapper (path selection) and pure-JAX reference.
# --------------------------------------------------------------------------
def global_layer_norm(y, gamma, beta, *, force_path=None, tile_k=None, tile_n=None):
    """y: [M, N, K], gamma/beta: [N, 1] -> [M, N, K].

    force_path: None (auto) | "resident" | "scratch" | "tiled".
    """
    M, N, K = y.shape
    itemsize = y.dtype.itemsize
    usable = _usable_vmem_bytes()
    vmem_limit = int(usable)

    slab = N * K * itemsize
    # Resident path: double-buffered in + out whole-slab blocks plus the
    # in-kernel f32 temporaries (y.astype(f32) and y*y) that the pipeline
    # buffers do not cover.
    resident_need = 4 * slab + 2 * N * K * 4 + 4 * N * 4 + (1 << 20)
    # Scratch path: one resident slab + small row-tile buffers/temps.
    tn_guess = tile_n if tile_n is not None else _choose_tile_n(N, K, itemsize)
    scratch_need = slab + tn_guess * K * (2 * itemsize + 12) + 8 * N + (1 << 20)

    if force_path == "resident" or (force_path is None and resident_need <= usable):
        return _gln_resident(y, gamma, beta, vmem_limit)
    if force_path == "scratch" or (force_path is None and scratch_need <= usable):
        return _gln_scratch(y, gamma, beta, vmem_limit, tile_n=tile_n)
    return _gln_tiled(y, gamma, beta, vmem_limit, tile_k=tile_k)


def global_layer_norm_ref(y, gamma, beta):
    """Pure-JAX reference matching the PyTorch forward exactly."""
    mean = jnp.mean(jnp.mean(y, axis=1, keepdims=True), axis=2, keepdims=True)
    var = jnp.mean(
        jnp.mean((y - mean) ** 2, axis=1, keepdims=True), axis=2, keepdims=True
    )
    return gamma[None, :, :] * (y - mean) / jnp.power(var + EPS, 0.5) + beta[None, :, :]


if __name__ == "__main__":
    def _check(M, N, K, tile_k=None, tile_n=None):
        key = jax.random.PRNGKey(0)
        ky, kg, kb = jax.random.split(key, 3)
        y = jax.random.normal(ky, (M, N, K), dtype=jnp.float32)
        # Non-trivial gamma/beta to exercise the fused scale/shift math.
        gamma = 1.0 + 0.1 * jax.random.normal(kg, (N, 1), dtype=jnp.float32)
        beta = 0.1 * jax.random.normal(kb, (N, 1), dtype=jnp.float32)
        ref = global_layer_norm_ref(y, gamma, beta)
        for path, kw in (("resident", {}),
                         ("scratch", {"tile_n": tile_n}),
                         ("tiled", {"tile_k": tile_k})):
            out = jax.block_until_ready(
                global_layer_norm(y, gamma, beta, force_path=path, **kw))
            assert out.shape == (M, N, K)
            assert jnp.allclose(out, ref, atol=1e-5, rtol=1e-5), (path, M, N, K)

    # Small gLN shapes (batch, channel_size, length).
    _check(2, 8, 256)                            # lane-aligned K, single row tile
    _check(2, 16, 200, tile_k=128, tile_n=8)     # ragged K (masked last tile), 2 row tiles

    # Auto path selection (resident for these sizes).
    key = jax.random.PRNGKey(0)
    y = jax.random.normal(key, (2, 8, 256), dtype=jnp.float32)
    gamma = jnp.ones((8, 1), jnp.float32)        # module init: gamma=1, beta=0
    beta = jnp.zeros((8, 1), jnp.float32)
    out = jax.block_until_ready(global_layer_norm(y, gamma, beta))
    assert jnp.allclose(out, global_layer_norm_ref(y, gamma, beta),
                        atol=1e-5, rtol=1e-5)

    print("KERNEL_OK")
</pallas_src>

<mosaic_0001>
module attributes {stable_mosaic.version = 11 : i64} {
  func.func @_gln_resident_kernel(%arg0: i32, %arg1: memref<1x8x256xf32, #tpu.memory_space<vmem>>, %arg2: memref<8x1xf32, #tpu.memory_space<vmem>>, %arg3: memref<8x1xf32, #tpu.memory_space<vmem>>, %arg4: memref<1x8x256xf32, #tpu.memory_space<vmem>>) attributes {dimension_semantics = [#tpu.dimension_semantics<parallel>], iteration_bounds = array<i64: 2>, scalar_prefetch = 0 : i64, scratch_operands = 0 : i64, tpu.core_type = #tpu.core_type<tc>, window_params = [{transform_indices = @transform_0, window_bounds = array<i64: 1, 8, 256>}, {pipeline_mode = #tpu.pipeline_mode<synchronous>, transform_indices = @transform_1, window_bounds = array<i64: 8, 1>}, {pipeline_mode = #tpu.pipeline_mode<synchronous>, transform_indices = @transform_2, window_bounds = array<i64: 8, 1>}, {transform_indices = @transform_3, window_bounds = array<i64: 1, 8, 256>}]} {
    %c0 = arith.constant 0 : index
    %c0_0 = arith.constant 0 : index
    %c0_1 = arith.constant 0 : index
    %0 = vector.load %arg1[%c0, %c0_0, %c0_1] : memref<1x8x256xf32, #tpu.memory_space<vmem>>, vector<1x8x256xf32>
    %1 = vector.shape_cast %0 : vector<1x8x256xf32> to vector<1x1x8x256xf32>
    %cst = arith.constant dense<0.000000e+00> : vector<1xf32>
    %2 = vector.multi_reduction <add>, %1, %cst [1, 2, 3] : vector<1x1x8x256xf32> to vector<1xf32>
    %3 = vector.shape_cast %2 : vector<1xf32> to vector<1x1x1x1xf32>
    %4 = vector.extract %3[0, 0, 0, 0] : f32 from vector<1x1x1x1xf32>
    %5 = arith.mulf %0, %0 : vector<1x8x256xf32>
    %6 = vector.shape_cast %5 : vector<1x8x256xf32> to vector<1x1x8x256xf32>
    %cst_2 = arith.constant dense<0.000000e+00> : vector<1xf32>
    %7 = vector.multi_reduction <add>, %6, %cst_2 [1, 2, 3] : vector<1x1x8x256xf32> to vector<1xf32>
    %8 = vector.shape_cast %7 : vector<1xf32> to vector<1x1x1x1xf32>
    %9 = vector.extract %8[0, 0, 0, 0] : f32 from vector<1x1x1x1xf32>
    %cst_3 = arith.constant 4.8828125E-4 : f32
    %10 = arith.mulf %4, %cst_3 : f32
    %cst_4 = arith.constant 4.8828125E-4 : f32
    %11 = arith.mulf %9, %cst_4 : f32
    %12 = arith.mulf %10, %10 : f32
    %13 = arith.subf %11, %12 : f32
    %cst_5 = arith.constant 0.000000e+00 : f32
    %14 = arith.maximumf %13, %cst_5 : f32
    %cst_6 = arith.constant 9.99999993E-9 : f32
    %15 = arith.addf %14, %cst_6 : f32
    %16 = math.rsqrt %15 : f32
    %c0_7 = arith.constant 0 : index
    %c0_8 = arith.constant 0 : index
    %17 = vector.load %arg2[%c0_7, %c0_8] : memref<8x1xf32, #tpu.memory_space<vmem>>, vector<8x1xf32>
    %c0_9 = arith.constant 0 : index
    %c0_10 = arith.constant 0 : index
    %18 = vector.load %arg3[%c0_9, %c0_10] : memref<8x1xf32, #tpu.memory_space<vmem>>, vector<8x1xf32>
    %19 = vector.broadcast %16 : f32 to vector<8x1xf32>
    %20 = arith.mulf %17, %19 : vector<8x1xf32>
    %21 = vector.shape_cast %20 : vector<8x1xf32> to vector<1x8x1xf32>
    %22 = vector.shape_cast %18 : vector<8x1xf32> to vector<1x8x1xf32>
    %23 = vector.broadcast %10 : f32 to vector<1x8x1xf32>
    %24 = arith.mulf %23, %21 : vector<1x8x1xf32>
    %25 = arith.subf %22, %24 : vector<1x8x1xf32>
    %26 = vector.broadcast %21 : vector<1x8x1xf32> to vector<1x8x256xf32>
    %27 = arith.mulf %0, %26 : vector<1x8x256xf32>
    %28 = vector.broadcast %25 : vector<1x8x1xf32> to vector<1x8x256xf32>
    %29 = arith.addf %27, %28 : vector<1x8x256xf32>
    %c0_11 = arith.constant 0 : index
    %c0_12 = arith.constant 0 : index
    %c0_13 = arith.constant 0 : index
    %30 = vector.load %arg4[%c0_11, %c0_12, %c0_13] : memref<1x8x256xf32, #tpu.memory_space<vmem>>, vector<1x8x256xf32>
    tpu.vector_store %arg4[%c0_11, %c0_12, %c0_13], %29 {strides = array<i32>} : memref<1x8x256xf32, #tpu.memory_space<vmem>>, vector<1x8x256xf32>,
    return
  }
  func.func @transform_0(%arg0: i32) -> (i32, i32, i32) {
    %c0_i32 = arith.constant 0 : i32
    %c0_i32_0 = arith.constant 0 : i32
    %c0_i32_1 = arith.constant 0 : i32
    return %arg0, %c0_i32, %c0_i32_0 : i32, i32, i32
  }
  func.func @transform_1(%arg0: i32) -> (i32, i32) {
    %c0_i32 = arith.constant 0 : i32
    %c0_i32_0 = arith.constant 0 : i32
    %c0_i32_1 = arith.constant 0 : i32
    return %c0_i32, %c0_i32_0 : i32, i32
  }
  func.func @transform_2(%arg0: i32) -> (i32, i32) {
    %c0_i32 = arith.constant 0 : i32
    %c0_i32_0 = arith.constant 0 : i32
    %c0_i32_1 = arith.constant 0 : i32
    return %c0_i32, %c0_i32_0 : i32, i32
  }
  func.func @transform_3(%arg0: i32) -> (i32, i32, i32) {
    %c0_i32 = arith.constant 0 : i32
    %c0_i32_0 = arith.constant 0 : i32
    %c0_i32_1 = arith.constant 0 : i32
    return %arg0, %c0_i32, %c0_i32_0 : i32, i32, i32
  }
}

</mosaic_0001>

<bundles_post_ra>
// kernel: tpu_custom_call.1
= control target key start
LH: loop header
LB: loop body
LE: loop exit
PB: predicated region body
PF: predicated region fallthrough
CT: control target
= control target key end

     0   :  { %8 = vsyncpa [#allocation3], 0  ;;  %s672_s0 = inlined_call_operand.hbm [shape: f32[2,8,256], index: 0, kind: input, shape index: {}]   ;;  %s673_s1 = inlined_call_operand.vmem [shape: f32[8,1], index: 1, kind: input, shape index: {}]   ;;  %s674_s2 = inlined_call_operand.vmem [shape: f32[8,1], index: 2, kind: input, shape index: {}]   ;;  %s675_s3 = inlined_call_operand.hbm [shape: f32[2,8,256], index: 3, kind: output, shape index: {}]  }
   0x1   :  { %10 = vsyncpa [#allocation3 + $0x1], 0 }
   0x2   :  { %11 = vsyncpa [#allocation4], 0 }
   0x3   :  { %13 = vsyncpa [#allocation4 + $0x1], 0  ;;  %s535_s12 = smov 0   ;;  %s537_s13 = smov 0  }
   0x4   :  { %s539_s14 = smov 0   ;;  %s541_s15 = smov 0  }
   0x5 LB: > { %s556_s16 = sadd.s32 4294967295, %s511_s15   ;;  %s341_s17 = sadd.s32 4294967294, %s511_s15   ;;  %s511_s15 = sphi %s541_s15, %s685_s15   ;;  %s507_s14 = sphi %s539_s14, %s684_s14   ;;  %s503_s13 = sphi %s537_s13, %s683_s13   ;;  %s499_s12 = sphi %s535_s12, %s682_s12  }
   0x6   : > { %s560_s18 = sadd.s32 1, %s511_s15   ;;  %s26_s19 = sadd.s32 1, %s507_s14 }
   0x7   : > { %s23_s20 = ssub.s32 %s511_s15, %s560_s18  ;;  %p33_p0 = scmp.ne.s32.totalorder %s507_s14, %s503_s13 }
   0x8   : > { %p24_p1 = scmp.eq.s32.totalorder %s23_s20, 0  ;;  %p34_p2 = scmp.eq.s32.totalorder %s511_s15, 0 }
   0x9   : > { %p39_p3 = scmp.ne.s32.totalorder %s503_s13, %s499_s12  ;;  %p40_p4 = scmp.eq.s32.totalorder %s556_s16, 0 }
   0xa   : > { %s572_s21 = scalar_select %p24_p1, %s507_s14, %s26_s19  }
   0xb   : > { %p574_p5 = por %p34_p2, %p33_p0  ;;  %p578_p6 = por %p40_p4, %p39_p3 }
   0xc   : > { %p105_p7 = scmp.eq.s32.totalorder %s556_s16, 1  ;;  %p111_p8 = scmp.eq.s32.totalorder %s341_s17, 1 }
   0xd   : > { %p375_p10 = scmp.lt.s32.totalorder %s511_s15, 2  ;;  %s137_s26 = sand.u32 1, %s507_s14  }
   0xe   : > { %p585_p11 = por %p105_p7, %p33_p0  ;;  %p589_p12 = por %p111_p8, %p39_p3 }
   0xf   : > { %s355_s27 = sshll.u32 %s511_s15, 4  ;;  %s344_s28 = sshll.u32 %s137_s26, 4 }
  0x10   : > { %s146_s4 = scalar_lea.hbm %s672_s0, %s355_s27  ;;  %s141_s6 = scalar_lea.vmem [#allocation2], %s344_s28 }
  0x11   : > { %s148_s5 = sshll.u32 %s146_s4, 4  ;;  %s150_s7 = sshll.u32 %s141_s6, 4  ;;  %s149_s5 = int_to_ptr.hbm [resolvable:$true] %s148_s5  ;;  %s151_s7 = int_to_ptr.vmem [resolvable:$true] %s150_s7 }
  0x12   : > { %p600_p13 = pnand %p375_p10, %p574_p5  ;;  %p347_p0 = scmp.ge.s32.totalorder %s511_s15, 1 }
  0x13   : > { %p155_p1 = scmp.lt.s32.totalorder %s511_s15, 3  ;;  %s138_s9 = scalar_lea.sflag [#allocation3], %s137_s26 }
  0x14   : > { %s415_s10 = sshra.s32 %s149_s5, 4  ;;  %p419_p3 = pneg %p600_p13  ;;  %s416_s10 = int_to_ptr.hbm [resolvable:$true] %s415_s10 }
  0x15   : > { %s417_s11 = scalar_lea.hbm %s416_s10, 16  ;;  %s422_s20 = scalar_lea.hbm %s672_s0, 32 }
  0x16   : > { %p418_p2 = scmp.ne.s32.totalorder %s416_s10, %s417_s11  ;;  %p423_p5 = scmp.lt.s32.totalorder %s416_s10, %s672_s0 }
  0x17   : > { %p424_p8 = scmp.lt.s32.totalorder %s422_s20, %s417_s11 }
  0x18   : > { %p420_p4 = pnand %p419_p3, %p418_p2 }
  0x19   : > { %p425_p10 = por %p424_p8, %p423_p5 }
  0x1a   : > { %p421_p7 = pneg %p420_p4 }
  0x1c   : > { %p426_p9 = pnand %p425_p10, %p421_p7 }
  0x1e   : > { %429 = shalt.err (!%p426_p9)
}
  0x1f   : > { %370 = dma.hbm_to_vmem [thread:$0]  (!%p600_p13), %s149_s5, 256, %s151_s7, %s138_s9  }
  0x20   : > { %p156_p2 = pnand %p347_p0, %p155_p1 }
  0x21   : > { %s621_s26 = sand.u32 (!%p156_p2), 1, %s503_s13  }
  0x22   : > { %159 = sbr.rel (%p156_p2) target bundleno = 437 (0x1b5), region = 32  ;;  %s348_s28 = sshll.u32 (!%p156_p2), %s621_s26, 4 }
  0x23   : > { %s162_s29 = scalar_lea.sflag (!%p156_p2), [#allocation3], %s621_s26  ;;  %s165_s30 = scalar_lea.vmem (!%p156_p2), [#allocation2], %s348_s28 }
  0x27   : > { %490 = dma.done.wait (%p578_p6), %s162_s29, 256  }
  0x28   : > { %492 = vsyncadd (%p578_p6), %s162_s29, 4294967040  ;;  %v189_v0 = vld [vmem:[%s165_s30] sm:$0xff]  ;;  %v190_v1 = vld [vmem:[%s165_s30 + $0x8] sm:$0xff]  ;;  %s513_s9 = smov 0.0   ;;  %v514_v28 = vmov 0   ;;  %s356_s29 = sshll.u32 %s556_s16, 4 }
  0x29   : > { %v191_v2 = vadd.f32 %v190_v1, %v189_v0  ;;  %v201_v3 = vmul.f32 %v189_v0, %v189_v0  ;;  %v202_v4 = vmul.f32 %v190_v1, %v190_v1  ;;  %411 = vset.pattern.permute.xlu1 %v514_v28  ;;  %412 = vset.pattern.permute.xlu0 %v514_v28  ;;  %v231_v29 = vld [vmem:[%s673_s1] sm:$0xff] }
  0x2a   : > { %v232_v34 = vld [vmem:[%s674_s2] sm:$0xff] }
  0x2b   : > { %192 = vadd.xlane.f32.xlu0 %v191_v2  ;;  %v203_v5 = vadd.f32 %v202_v4, %v201_v3 }
  0x33   : > { %204 = vadd.xlane.f32.xlu0 %v203_v5 }
  0x9e   : > { %v193_v6 = vpop.xlane.xlu0 %192 }
  0x9f   : > { %v194_v7 = vrot.slane %v193_v6, 4 }
  0xa1   : > { %v195_v8 = vadd.f32 %v194_v7, %v193_v6 }
  0xa3   : > { %v196_v9 = vrot.slane %v195_v8, 2 }
  0xa5   : > { %v197_v10 = vadd.f32 %v196_v9, %v195_v8 }
  0xa6   : > { %v205_v11 = vpop.xlane.xlu0 %204 }
  0xa7   : > { %v206_v12 = vrot.slane %v205_v11, 4  ;;  %v198_v13 = vrot.slane %v197_v10, 1 }
  0xa9   : > { %v207_v14 = vadd.f32 %v206_v12, %v205_v11  ;;  %v199_v15 = vadd.f32 %v198_v13, %v197_v10 }
  0xab   : > { %v208_v16 = vrot.slane %v207_v14, 2  ;;  %357 = vpush %v199_v15 }
  0xad   : > { %v209_v17 = vadd.f32 %v208_v16, %v207_v14 }
  0xaf   : > { %v210_v18 = vrot.slane %v209_v17, 1 }
  0xb1   : > { %v211_v19 = vadd.f32 %v210_v18, %v209_v17 }
  0xb3   : > { %359 = vpush %v211_v19 }
  0xdc   : > { %s358_s23 = spop %357 }
  0xdd   : > { %s213_s4 = smul.f32 0.00048828125, %s358_s23 }
  0xdf   : > { %s215_s5 = smul.f32 %s213_s4, %s213_s4  ;;  %v235_v32 = vstv %s213_s4 }
  0xe4   : > { %s360_s6 = spop %359 }
  0xe5   : > { %s214_s7 = smul.f32 0.00048828125, %s360_s6  ;;  %s188_s6 = scalar_lea.vmem [#allocation5], %s348_s28 }
  0xe6   : > { %s268_s4 = sshll.u32 %s188_s6, 4  ;;  %s465_s28 = scalar_lea.hbm %s675_s3, 32  ;;  %s269_s4 = int_to_ptr.vmem [resolvable:$true] %s268_s4 }
  0xe7   : > { %s216_s8 = ssub.f32 %s214_s7, %s215_s5  ;;  %s266_s5 = scalar_lea.hbm %s675_s3, %s356_s29 }
  0xe8   : > { %s270_s7 = sshll.u32 %s266_s5, 4  ;;  %s271_s7 = int_to_ptr.hbm [resolvable:$true] %s270_s7 }
  0xe9   : > { %s217_s10 = smax.f32 %s513_s9, %s216_s8  ;;  %s255_s8 = scalar_lea.sflag [#allocation4], %s621_s26 }
  0xea   : > { %s218_s11 = sadd.f32 1e-08, %s217_s10  ;;  %s459_s16 = sshra.s32 %s271_s7, 4  ;;  %s460_s16 = int_to_ptr.hbm [resolvable:$true] %s459_s16 }
  0xeb   : > { %s461_s9 = scalar_lea.hbm %s460_s16, 16  ;;  %p466_p0 = scmp.lt.s32.totalorder %s460_s16, %s675_s3 }
  0xec   : > { %v219_v20 = vstv %s218_s11  ;;  %p462_p6 = scmp.ne.s32.totalorder %s460_s16, %s461_s9  ;;  %p467_p1 = scmp.lt.s32.totalorder %s465_s28, %s461_s9 }
  0xed   : > { %413 = vrsqrt.f32 %v219_v20  ;;  %vm226_vm1 = vweird.f32 %v219_v20 }
  0xee   : > { %p463_p9 = pnand %p462_p6, %p585_p11  ;;  %p468_p3 = por %p467_p1, %p466_p0 }
  0xf0   : > { %p464_p13 = pneg %p463_p9 }
  0xf2   : > { %p469_p4 = pnand %p468_p3, %p464_p13 }
  0xf3   : > { %v414_v21 = vpop.eup %413 }
  0xf4   : > { %v221_v22 = vmul.f32 %v414_v21, %v219_v20  ;;  %vm227_vm0 = vweird.f32 %v414_v21 }
  0xf5   : > { %vm228_vm2 = vmor %vm226_vm1, %vm227_vm0 }
  0xf6   : > { %v222_v23 = vmul.f32 %v414_v21, %v221_v22 }
  0xf8   : > { %v223_v24 = vmul.f32 0.5, %v222_v23 }
  0xfa   : > { %v224_v25 = vsub.f32 1.5, %v223_v24 }
  0xfc   : > { %v225_v26 = vmul.f32 %v414_v21, %v224_v25 }
  0xfe   : > { %v229_v27 = vsel %vm228_vm2, %v414_v21, %v225_v26 }
  0xff   : > { %361 = vpush %v229_v27 }
 0x130   : > { %s362_s20 = spop %361 }
 0x131   : > { %v233_v30 = vstv %s362_s20 }
 0x132   : > { %v234_v31 = vmul.f32 %v233_v30, %v231_v29 }
 0x134   : > { %240 = vperm.xlu1 %411, %v234_v31   ;;  %v236_v33 = vmul.f32 %v235_v32, %v234_v31 }
 0x136   : > { %v237_v35 = vsub.f32 %v232_v34, %v236_v33 }
 0x13c   : > { %247 = vperm.xlu1 %411, %v237_v35  }
 0x1a6   : > { %v241_v36 = vpop.permute.xlu1 %240 }
 0x1a7   : > { %v243_v37 = vmul.f32 %v241_v36, %v189_v0  ;;  %v244_v38 = vmul.f32 %v241_v36, %v190_v1 }
 0x1ae   : > { %v248_v39 = vpop.permute.xlu1 %247 }
 0x1af   : > { %v250_v40 = vadd.f32 %v248_v39, %v243_v37  ;;  %v251_v41 = vadd.f32 %v248_v39, %v244_v38 }
 0x1b1   : > { %252 = vst [vmem:[%s188_s6] sm:$0xff] %v250_v40 }
 0x1b2   : > { %253 = vst [vmem:[%s188_s6 + $0x8] sm:$0xff] %v251_v41 }
 0x1b3   : > { %472 = shalt.err (!%p469_p4)
}
 0x1b4   : > { %365 = dma.vmem_to_hbm [thread:$0]  (%p585_p11), %s269_s4, 256, %s271_s7, %s255_s8  }
 0x1b5 PF: > { %s282_s26 = sand.u32 1, %s499_s12   ;;  %p681_p7 = scmp.ge.s32.totalorder %s511_s15, 2 }
 0x1b6   : > { %s283_s20 = scalar_lea.sflag [#allocation4], %s282_s26 }
 0x1b7   : > { %p372_p5 = pnand %p681_p7, %p589_p12 }
 0x1b9   : > { %p373_p8 = pneg %p372_p5 }
 0x1bb   : > { %494 = dma.done.wait (%p373_p8), %s283_s20, 256  }
 0x1bc   : > { %496 = vsyncadd (%p373_p8), %s283_s20, 4294967040  ;;  %p16_p10 = scmp.ge.s32.totalorder %s560_s18, 4   ;;  %s682_s12 = smov %s503_s13 }
 0x1bd   : > { %s683_s13 = smov %s507_s14  ;;  %s684_s14 = smov %s572_s21 }
 0x1be   : > { %s685_s15 = smov %s560_s18  ;;  %18 = sbr.rel (!%p16_p10) target bundleno = 5 (0x5), region = 77 }
 0x1c3   :  { %289 = vsyncpa [#allocation3], 1 }
 0x1c4   :  { %291 = vsyncpa [#allocation3 + $0x1], 1 }
 0x1c5   :  { %292 = vsyncpa [#allocation4], 1 }
 0x1c6   :  { %294 = vsyncpa [#allocation4 + $0x1], 1 }

</bundles_post_ra>
